<compile_context>
chip_gen: v7x
topology: tpu7x:2x2x1
jax: 0.10.0
libtpu: 0.0.40
codegen_flags: <defaults>
</compile_context>

<pallas_src>
import functools

import jax
import jax.numpy as jnp
from jax.experimental import pallas as pl
from jax.experimental.pallas import tpu as pltpu

_LANE = 128
_SUBLANE = 8
_MAX_TB = 4096                                # max batch tile (rows per grid step)
_TARGET_GRID_STEPS = 4                        # aim for >=2 tiles so v7x's 2 TCs share work
_VMEM_TILE_BUDGET = 40 * 1024 * 1024          # TB sizing target (safe on v7x's 64 MiB)
_VMEM_LIMIT_BYTES = 48 * 1024 * 1024          # explicit scoped-VMEM limit (all gens)


def _round_up(n, m):
    return ((n + m - 1) // m) * m


def _mlp_kernel(x_ref, w1_ref, b1_ref, w2_ref, b2_ref, o_ref):
    # fc1 + bias + ReLU (f32 accumulation on the MXU).  x cast matches the weight
    # dtype (no-op for f32; enables the bf16 weight path on v5e).
    x = x_ref[...].astype(w1_ref.dtype)
    h = jnp.dot(x, w1_ref[...], preferred_element_type=jnp.float32)
    h = jnp.maximum(h + b1_ref[...], 0.0)                    # (TB, H) + (1, H)
    # Dropout(p=0.3): identity in eval/inference mode (PyTorch module.eval()).
    # TODO(synk): training-mode dropout (pltpu.prng_random_bits mask) not implemented.
    y = jnp.dot(h.astype(w2_ref.dtype), w2_ref[...],
                preferred_element_type=jnp.float32)          # (TB, O_pad)
    od = o_ref.shape[-1]
    # Store only the real logits; HBM output stays narrow (TB, out_dim).
    o_ref[...] = (y[:, :od] + b2_ref[...]).astype(o_ref.dtype)


def prepare_params(w1, b1, w2, b2, compute_dtype=jnp.float32):
    """One-time parameter massaging, hoisted out of the per-call hot path.

    w1: (D, H); b1: (H,); w2: (H, O); b2: (O,)   (weights stored as in x out,
    i.e. transposed vs PyTorch nn.Linear, so the kernel does y = x @ W + b).
    compute_dtype=jnp.bfloat16 is recommended on v5e (bf16-only MXU); keep f32
    elsewhere unless profiling says the MXU is the binding slot.
    """
    D, H = w1.shape
    O = w2.shape[1]
    O_pad = max(_LANE, _round_up(O, _LANE))            # lane-dense MXU operand only
    w1_c = w1.astype(compute_dtype)
    w2_p = jnp.zeros((H, O_pad), dtype=compute_dtype).at[:, :O].set(
        w2.astype(compute_dtype))
    b1_r = b1.reshape(1, H).astype(jnp.float32)
    b2_r = b2.reshape(1, O).astype(jnp.float32)        # unpadded: output is narrow
    return (w1_c, b1_r, w2_p, b2_r), O


def _pick_batch_tile(B, D, H, O_pad, out_dim, itemsize):
    """Largest TB (multiple of 8, <= _MAX_TB) such that resident weights plus
    double-buffered x/out tiles fit the VMEM budget, while keeping ~_TARGET_GRID_STEPS
    grid steps so v7x's two TensorCores have tiles to shard."""
    if B <= _SUBLANE:
        return B                                        # single full-array tile
    resident = (D * H + H * O_pad + H + out_dim) * itemsize
    tb = _round_up(pl.cdiv(B, _TARGET_GRID_STEPS), _SUBLANE)
    tb = max(_SUBLANE, min(_MAX_TB, tb))
    while tb > _SUBLANE:
        tile_bytes = 2 * tb * (D + out_dim) * itemsize  # double-buffered x + out tiles
        if resident + tile_bytes <= _VMEM_TILE_BUDGET:
            break
        tb -= _SUBLANE
    return max(tb, _SUBLANE)


@functools.partial(jax.jit, static_argnames=("out_dim",))
def popularity_classifier_forward(x, packed_params, out_dim):
    """x: (B, D) f32; packed_params from prepare_params(). Returns (B, out_dim) logits."""
    w1, b1_r, w2_p, b2_r = packed_params
    B, D = x.shape
    H = w1.shape[1]
    O_pad = w2_p.shape[1]

    TB = _pick_batch_tile(B, D, H, O_pad, out_dim, jnp.dtype(x.dtype).itemsize)
    grid = (pl.cdiv(B, TB),)   # ragged last tile handled by Pallas (masked writes)

    return pl.pallas_call(
        _mlp_kernel,
        out_shape=jax.ShapeDtypeStruct((B, out_dim), jnp.float32),
        grid_spec=pltpu.PrefetchScalarGridSpec(
            num_scalar_prefetch=0,
            grid=grid,
            in_specs=[
                pl.BlockSpec((TB, D), lambda i: (i, 0)),       # batch-tiled activations
                pl.BlockSpec((D, H), lambda i: (0, 0)),        # weights VMEM-resident
                pl.BlockSpec((1, H), lambda i: (0, 0)),
                pl.BlockSpec((H, O_pad), lambda i: (0, 0)),
                pl.BlockSpec((1, out_dim), lambda i: (0, 0)),
            ],
            out_specs=pl.BlockSpec((TB, out_dim), lambda i: (i, 0)),
        ),
        compiler_params=pltpu.CompilerParams(
            dimension_semantics=("parallel",),   # shard batch tiles across TCs on v7x
            vmem_limit_bytes=_VMEM_LIMIT_BYTES,
        ),
    )(x, w1, b1_r, w2_p, b2_r)


def init_params(key, input_dim, hidden_dim=128, output_dim=3):
    """Deterministic init mimicking nn.Linear's U(-1/sqrt(fan_in), 1/sqrt(fan_in))."""
    k1, k2, k3, k4 = jax.random.split(key, 4)
    bound1 = 1.0 / jnp.sqrt(jnp.float32(input_dim))
    bound2 = 1.0 / jnp.sqrt(jnp.float32(hidden_dim))
    w1 = jax.random.uniform(k1, (input_dim, hidden_dim), jnp.float32, -bound1, bound1)
    b1 = jax.random.uniform(k2, (hidden_dim,), jnp.float32, -bound1, bound1)
    w2 = jax.random.uniform(k3, (hidden_dim, output_dim), jnp.float32, -bound2, bound2)
    b2 = jax.random.uniform(k4, (output_dim,), jnp.float32, -bound2, bound2)
    return w1, b1, w2, b2


if __name__ == "__main__":
    key = jax.random.PRNGKey(0)
    kx, kx2, kx3, kp = jax.random.split(key, 4)

    input_dim, hidden_dim, output_dim = 32, 128, 3
    w1, b1, w2, b2 = init_params(kp, input_dim, hidden_dim, output_dim)
    packed, out_dim = prepare_params(w1, b1, w2, b2)   # f32 compute path

    def ref_fn(x):
        return jnp.maximum(x @ w1 + b1, 0.0) @ w2 + b2

    # Small batch (single tile equal to the full array, grid=(1,)).
    x_small = jax.random.normal(kx, (8, input_dim), dtype=jnp.float32)
    logits_small = jax.block_until_ready(
        popularity_classifier_forward(x_small, packed, out_dim))
    assert logits_small.shape == (8, output_dim)
    assert jnp.allclose(logits_small, ref_fn(x_small), atol=1e-5, rtol=1e-5), \
        "small-batch mismatch vs reference"

    # Ragged batch: B not a multiple of 8 -> masked writes on the last tile.
    x_ragged = jax.random.normal(kx3, (10, input_dim), dtype=jnp.float32)
    logits_ragged = jax.block_until_ready(
        popularity_classifier_forward(x_ragged, packed, out_dim))
    assert logits_ragged.shape == (10, output_dim)
    assert jnp.allclose(logits_ragged, ref_fn(x_ragged), atol=1e-5, rtol=1e-5), \
        "ragged-batch mismatch vs reference"

    # Larger batch: multi-tile grid (>=2 tiles for v7x) + ragged final tile.
    x_big = jax.random.normal(kx2, (520, input_dim), dtype=jnp.float32)
    logits_big = jax.block_until_ready(
        popularity_classifier_forward(x_big, packed, out_dim))
    assert logits_big.shape == (520, output_dim)
    assert jnp.allclose(logits_big, ref_fn(x_big), atol=1e-4, rtol=1e-4), \
        "tiled-batch mismatch vs reference"

    print("KERNEL_OK")
</pallas_src>

<mosaic_0001>
module attributes {stable_mosaic.version = 11 : i64} {
  func.func @_mlp_kernel(%arg0: i32, %arg1: memref<8x32xf32, #tpu.memory_space<vmem>>, %arg2: memref<32x128xf32, #tpu.memory_space<vmem>>, %arg3: memref<1x128xf32, #tpu.memory_space<vmem>>, %arg4: memref<128x128xf32, #tpu.memory_space<vmem>>, %arg5: memref<1x3xf32, #tpu.memory_space<vmem>>, %arg6: memref<8x3xf32, #tpu.memory_space<vmem>>) attributes {dimension_semantics = [#tpu.dimension_semantics<parallel>], iteration_bounds = array<i64: 1>, scalar_prefetch = 0 : i64, scratch_operands = 0 : i64, tpu.core_type = #tpu.core_type<tc>, window_params = [{transform_indices = @transform_0, window_bounds = array<i64: 8, 32>}, {pipeline_mode = #tpu.pipeline_mode<synchronous>, transform_indices = @transform_1, window_bounds = array<i64: 32, 128>}, {pipeline_mode = #tpu.pipeline_mode<synchronous>, transform_indices = @transform_2, window_bounds = array<i64: 1, 128>}, {pipeline_mode = #tpu.pipeline_mode<synchronous>, transform_indices = @transform_3, window_bounds = array<i64: 128, 128>}, {pipeline_mode = #tpu.pipeline_mode<synchronous>, transform_indices = @transform_4, window_bounds = array<i64: 1, 3>}, {transform_indices = @transform_5, window_bounds = array<i64: 8, 3>}]} {
    %c0 = arith.constant 0 : index
    %c0_0 = arith.constant 0 : index
    %0 = vector.load %arg1[%c0, %c0_0] : memref<8x32xf32, #tpu.memory_space<vmem>>, vector<8x32xf32>
    %c0_1 = arith.constant 0 : index
    %c0_2 = arith.constant 0 : index
    %1 = vector.load %arg2[%c0_1, %c0_2] : memref<32x128xf32, #tpu.memory_space<vmem>>, vector<32x128xf32>
    %cst = arith.constant dense<0.000000e+00> : vector<8x128xf32>
    %2 = tpu.matmul %0, %1, %cst {dimension_numbers = #tpu.dot_dimension_numbers<[1], [0], [0], [1], [0, 0, 1, 1], [], []>} : vector<8x32xf32>, vector<32x128xf32>, vector<8x128xf32> -> vector<8x128xf32>
    %c0_3 = arith.constant 0 : index
    %c0_4 = arith.constant 0 : index
    %3 = vector.load %arg3[%c0_3, %c0_4] : memref<1x128xf32, #tpu.memory_space<vmem>>, vector<1x128xf32>
    %4 = vector.broadcast %3 : vector<1x128xf32> to vector<8x128xf32>
    %5 = arith.addf %2, %4 : vector<8x128xf32>
    %cst_5 = arith.constant 0.000000e+00 : f32
    %6 = vector.broadcast %cst_5 : f32 to vector<8x128xf32>
    %7 = arith.maximumf %5, %6 : vector<8x128xf32>
    %c0_6 = arith.constant 0 : index
    %c0_7 = arith.constant 0 : index
    %8 = vector.load %arg4[%c0_6, %c0_7] : memref<128x128xf32, #tpu.memory_space<vmem>>, vector<128x128xf32>
    %cst_8 = arith.constant dense<0.000000e+00> : vector<8x128xf32>
    %9 = tpu.matmul %7, %8, %cst_8 {dimension_numbers = #tpu.dot_dimension_numbers<[1], [0], [0], [1], [0, 0, 1, 1], [], []>} : vector<8x128xf32>, vector<128x128xf32>, vector<8x128xf32> -> vector<8x128xf32>
    %10 = vector.extract_strided_slice %9 {offsets = [0, 0], sizes = [8, 3], strides = [1, 1]} : vector<8x128xf32> to vector<8x3xf32>
    %c0_9 = arith.constant 0 : index
    %c0_10 = arith.constant 0 : index
    %11 = vector.load %arg5[%c0_9, %c0_10] : memref<1x3xf32, #tpu.memory_space<vmem>>, vector<1x3xf32>
    %12 = vector.broadcast %11 : vector<1x3xf32> to vector<8x3xf32>
    %13 = arith.addf %10, %12 : vector<8x3xf32>
    %c0_11 = arith.constant 0 : index
    %c0_12 = arith.constant 0 : index
    %14 = vector.load %arg6[%c0_11, %c0_12] : memref<8x3xf32, #tpu.memory_space<vmem>>, vector<8x3xf32>
    tpu.vector_store %arg6[%c0_11, %c0_12], %13 {strides = array<i32>} : memref<8x3xf32, #tpu.memory_space<vmem>>, vector<8x3xf32>,
    return
  }
  func.func @transform_0(%arg0: i32) -> (i32, i32) {
    %c0_i32 = arith.constant 0 : i32
    %c0_i32_0 = arith.constant 0 : i32
    return %arg0, %c0_i32 : i32, i32
  }
  func.func @transform_1(%arg0: i32) -> (i32, i32) {
    %c0_i32 = arith.constant 0 : i32
    %c0_i32_0 = arith.constant 0 : i32
    %c0_i32_1 = arith.constant 0 : i32
    return %c0_i32, %c0_i32_0 : i32, i32
  }
  func.func @transform_2(%arg0: i32) -> (i32, i32) {
    %c0_i32 = arith.constant 0 : i32
    %c0_i32_0 = arith.constant 0 : i32
    %c0_i32_1 = arith.constant 0 : i32
    return %c0_i32, %c0_i32_0 : i32, i32
  }
  func.func @transform_3(%arg0: i32) -> (i32, i32) {
    %c0_i32 = arith.constant 0 : i32
    %c0_i32_0 = arith.constant 0 : i32
    %c0_i32_1 = arith.constant 0 : i32
    return %c0_i32, %c0_i32_0 : i32, i32
  }
  func.func @transform_4(%arg0: i32) -> (i32, i32) {
    %c0_i32 = arith.constant 0 : i32
    %c0_i32_0 = arith.constant 0 : i32
    %c0_i32_1 = arith.constant 0 : i32
    return %c0_i32, %c0_i32_0 : i32, i32
  }
  func.func @transform_5(%arg0: i32) -> (i32, i32) {
    %c0_i32 = arith.constant 0 : i32
    %c0_i32_0 = arith.constant 0 : i32
    return %arg0, %c0_i32 : i32, i32
  }
}

</mosaic_0001>

<bundles_post_ra>
// kernel: popularity_classifier_forward.1
= control target key start
LH: loop header
LB: loop body
LE: loop exit
PB: predicated region body
PF: predicated region fallthrough
CT: control target
= control target key end

     0   :  { %10 = vsyncpa [#allocation3], 0  ;;  %s516_s0 = inlined_call_operand.hbm [shape: f32[8,32], index: 0, kind: input, shape index: {}]   ;;  %s517_s1 = inlined_call_operand.hbm [shape: f32[32,128], index: 1, kind: input, shape index: {}]   ;;  %s518_s2 = inlined_call_operand.vmem [shape: f32[1,128], index: 2, kind: input, shape index: {}]   ;;  %s519_s3 = inlined_call_operand.hbm [shape: f32[128,128], index: 3, kind: input, shape index: {}]   ;;  %s520_s4 = inlined_call_operand.vmem [shape: f32[1,3], index: 4, kind: input, shape index: {}]   ;;  %s521_s5 = inlined_call_operand.vmem [shape: f32[8,3], index: 5, kind: output, shape index: {}]  }
   0x1   :  { %11 = vsyncpa [#allocation5], 0  ;;  %s427_s18 = smov [#allocation4]   ;;  %s357_s22 = scalar_lea.hbm %s517_s1, 512 }
   0x2   :  { %s27_s19 = sshll.u32 %s427_s18, 4  ;;  %p358_p0 = scmp.ne.s32.totalorder %s517_s1, %s357_s22  ;;  %s28_s19 = int_to_ptr.vmem [resolvable:$true] %s27_s19 }
   0x3   :  { %p361_p1 = scmp.lt.u32.totalorder %s357_s22, %s517_s1 }
   0x5   :  { %p363_p2 = pnand %p361_p1, %p358_p0 }
   0x7   :  { %366 = shalt.err (!%p363_p2)
}
   0x8   :  { %s367_s27 = scalar_lea.vmem %s28_s19, 512  ;;  %p372_p4 = scmp.lt.s32.totalorder %s28_s19, %s28_s19 }
   0x9   :  { %p368_p3 = scmp.ne.s32.totalorder %s28_s19, %s367_s27  ;;  %p373_p5 = scmp.lt.s32.totalorder %s367_s27, %s367_s27 }
   0xb   :  { %p374_p6 = por %p373_p5, %p372_p4 }
   0xd   :  { %p375_p7 = pnand %p374_p6, %p368_p3 }
   0xf   :  { %378 = shalt.err (!%p375_p7)
}
  0x10   :  { %s428_s28 = smov 128   ;;  %s429_s29 = smov 8  }
  0x11   :  { %33 = dma.hbm_to_vmem [thread:$0]  %s517_s1, 512, %s28_s19, [#allocation5], %s428_s28, %s428_s28, %s429_s29  }
  0x12   :  { %s430_s7 = smov [#allocation2]   ;;  %s431_s9 = smov [#allocation6]  }
  0x13   :  { %s18_s8 = sshll.u32 %s430_s7, 4  ;;  %s41_s10 = sshll.u32 %s431_s9, 4  ;;  %s19_s8 = int_to_ptr.vmem [resolvable:$true] %s18_s8  ;;  %s42_s10 = int_to_ptr.vmem [resolvable:$true] %s41_s10 }
  0x14   :  { %s379_s13 = scalar_lea.hbm %s516_s0, 128 }
  0x15   :  { %p380_p8 = scmp.ne.s32.totalorder %s516_s0, %s379_s13  ;;  %p383_p9 = scmp.lt.u32.totalorder %s379_s13, %s516_s0 }
  0x17   :  { %p385_p10 = pnand %p383_p9, %p380_p8 }
  0x19   :  { %388 = shalt.err (!%p385_p10)
}
  0x1a   :  { %s389_s1 = scalar_lea.vmem %s19_s8, 128  ;;  %p394_p12 = scmp.lt.s32.totalorder %s19_s8, %s19_s8 }
  0x1b   :  { %p390_p11 = scmp.ne.s32.totalorder %s19_s8, %s389_s1  ;;  %p395_p13 = scmp.lt.s32.totalorder %s389_s1, %s389_s1 }
  0x1d   :  { %p396_p0 = por %p395_p13, %p394_p12 }
  0x1f   :  { %p397_p1 = pnand %p396_p0, %p390_p11 }
  0x21   :  { %400 = shalt.err (!%p397_p1)
}
  0x22   :  { %21 = dma.hbm_to_vmem [thread:$0]  %s516_s0, 128, %s19_s8, [#allocation3]  }
  0x23   :  { %s401_s22 = scalar_lea.hbm %s519_s3, 2048 }
  0x24   :  { %p402_p2 = scmp.ne.s32.totalorder %s519_s3, %s401_s22  ;;  %p405_p3 = scmp.lt.u32.totalorder %s401_s22, %s519_s3 }
  0x26   :  { %p407_p4 = pnand %p405_p3, %p402_p2 }
  0x28   :  { %410 = shalt.err (!%p407_p4)
}
  0x29   :  { %s411_s27 = scalar_lea.vmem %s42_s10, 2048  ;;  %p416_p6 = scmp.lt.s32.totalorder %s42_s10, %s42_s10 }
  0x2a   :  { %p412_p5 = scmp.ne.s32.totalorder %s42_s10, %s411_s27  ;;  %p417_p7 = scmp.lt.s32.totalorder %s411_s27, %s411_s27 }
  0x2c   :  { %p418_p8 = por %p417_p7, %p416_p6 }
  0x2e   :  { %p419_p9 = pnand %p418_p8, %p412_p5 }
  0x30   :  { %422 = shalt.err (!%p419_p9)
}
  0x31   :  { %47 = dma.hbm_to_vmem [thread:$0]  %s519_s3, 2048, %s42_s10, [#allocation5], %s428_s28, %s428_s28, %s429_s29  }
  0x32   :  { %423 = dma.done.wait [#allocation3], 128  }
  0x33   :  { %424 = vsyncadd [#allocation3], 4294967168 }
  0x34   :  { %425 = dma.done.wait [#allocation5], 2560  }
  0x35   :  { %426 = vsyncadd [#allocation5], 4294964736  ;;  %v432_v0 = vmov 0.0|0.0   ;;  %vm433_vm0 = vmmov 0   ;;  %v434_v1 = vmov 0.0   ;;  %v60_v2 = vld [vmem:[#allocation4] sm:$0xff] }
  0x36   :  { %319 = vmatprep.subr.bf16.mxu0 %v432_v0  ;;  %281 = vmatprep.mubr.msk.f32.mxu0 %vm433_vm0, %v434_v1  ;;  %v61_v3 = vld [vmem:[#allocation4 + $0x8] sm:$0xff]  ;;  %v62_v4 = vld [vmem:[#allocation4 + $0x10] sm:$0xff]  ;;  %v63_v6 = vld [vmem:[#allocation4 + $0x18] sm:$0xff]  ;;  %vm71_vm1 = vcmask 261120   ;;  %vm240_vm2 = vcmask 23552  }
  0x37   :  { %325 = vmatprep.subr.bf16.mxu1 %v432_v0  ;;  %316 = vmatprep.mubr.msk.f32.mxu1 %vm433_vm0, %v434_v1  ;;  %v320_v5 = vpack.c.bf16 %v61_v3, %v60_v2  ;;  %v146_v7 = vld [vmem:[#allocation6] sm:$0xff]  ;;  %v147_v8 = vld [vmem:[#allocation6 + $0x8] sm:$0xff]  ;;  %v148_v9 = vld [vmem:[#allocation6 + $0x10] sm:$0xff]  ;;  %v323_v11 = vpack.c.bf16 %v63_v6, %v62_v4 }
  0x38   :  { %v149_v10 = vld [vmem:[#allocation6 + $0x18] sm:$0xff]  ;;  %v326_v12 = vpack.c.bf16 %v147_v8, %v146_v7  ;;  %v150_v14 = vld [vmem:[#allocation6 + $0x20] sm:$0xff]  ;;  %v151_v15 = vld [vmem:[#allocation6 + $0x28] sm:$0xff] }
  0x39   :  { %321 = vmatpush3.bf16.msra.mxu0 %v320_v5  ;;  %v329_v13 = vpack.c.bf16 %v149_v10, %v148_v9  ;;  %v59_v16 = vld [vmem:[#allocation2] sm:$0xff]  ;;  %v332_v17 = vpack.c.bf16 %v151_v15, %v150_v14  ;;  %v152_v18 = vld [vmem:[#allocation6 + $0x30] sm:$0xff]  ;;  %v154_v21 = vld [vmem:[#allocation6 + $0x40] sm:$0xff] }
  0x3a   :  { %322 = vmatprep.subr.bf16.mxu0 %v432_v0  ;;  %327 = vmatpush3.bf16.msra.mxu1 %v326_v12  ;;  %v153_v19 = vld [vmem:[#allocation6 + $0x38] sm:$0xff]  ;;  %v155_v22 = vld [vmem:[#allocation6 + $0x48] sm:$0xff]  ;;  %v156_v24 = vld [vmem:[#allocation6 + $0x50] sm:$0xff] }
  0x3b   :  { %328 = vmatprep.subr.bf16.mxu1 %v432_v0  ;;  %v335_v20 = vpack.c.bf16 %v153_v19, %v152_v18  ;;  %v338_v23 = vpack.c.bf16 %v155_v22, %v154_v21  ;;  %v157_v25 = vld [vmem:[#allocation6 + $0x58] sm:$0xff]  ;;  %v158_v27 = vld [vmem:[#allocation6 + $0x60] sm:$0xff]  ;;  %v159_v28 = vld [vmem:[#allocation6 + $0x68] sm:$0xff] }
  0x3c   :  { %v341_v26 = vpack.c.bf16 %v157_v25, %v156_v24  ;;  %v344_v29 = vpack.c.bf16 %v159_v28, %v158_v27  ;;  %v160_v30 = vld [vmem:[#allocation6 + $0x70] sm:$0xff]  ;;  %v161_v31 = vld [vmem:[#allocation6 + $0x78] sm:$0xff] }
  0x3d   :  { %324 = vmatpush3.bf16.msra.mxu0 %v323_v11  ;;  %v347_v32 = vpack.c.bf16 %v161_v31, %v160_v30  ;;  %v248_v33 = vld [vmem:[%s518_s2] ss:$0 sm:$0xff] }
  0x3e   :  { %330 = vmatpush3.bf16.msra.mxu1 %v329_v13  ;;  %v250_v38 = vld [vmem:[%s520_s4] ss:$0 sm:$0xff] }
  0x3f   :  { %331 = vmatprep.subr.bf16.mxu1 %v432_v0 }
  0x40   :  { %282 = vmatmul.mubr.msk.f32.vlgmr.msra.gmra.mrb[0].mxu0 %vm71_vm1, %v59_v16 }
  0x42   :  { %333 = vmatpush3.bf16.msra.mxu1 %v332_v17 }
  0x43   :  { %334 = vmatprep.subr.bf16.mxu1 %v432_v0 }
  0x46   :  { %336 = vmatpush3.bf16.msra.mxu1 %v335_v20 }
  0x47   :  { %337 = vmatprep.subr.bf16.mxu1 %v432_v0 }
  0x4a   :  { %339 = vmatpush3.bf16.msra.mxu1 %v338_v23 }
  0x4b   :  { %340 = vmatprep.subr.bf16.mxu1 %v432_v0 }
  0x4e   :  { %342 = vmatpush3.bf16.msra.mxu1 %v341_v26 }
  0x4f   :  { %343 = vmatprep.subr.bf16.mxu1 %v432_v0 }
  0x52   :  { %345 = vmatpush3.bf16.msra.mxu1 %v344_v29 }
  0x53   :  { %346 = vmatprep.subr.bf16.mxu1 %v432_v0 }
  0x56   :  { %348 = vmatpush3.bf16.msra.mxu1 %v347_v32 }
 0x113   :  { %v141_v34 = vpop.f32.mrb[0].mxu0 }
 0x114   :  { %v142_v35 = vadd.f32 %v248_v33, %v141_v34  ;;  %v283_v36 = vpop.f32.mrb[1].mxu0 }
 0x116   :  { %v145_v37 = vmax.f32 %v142_v35, 0.0 }
 0x118   :  { %317 = vmatmul.mubr.f32.vlgmr.msra.gmra.mrb[0].mxu1 %v145_v37 }
 0x1eb   :  { %v228_v39 = vpop.f32.mrb[0].mxu1 }
 0x1ec   :  { %v239_v40 = vadd.f32 %v250_v38, %v228_v39  ;;  %v318_v41 = vpop.f32.mrb[1].mxu1 }
 0x1ee   :  { %241 = vst.msk [vmem:[%s521_s5] sm:$0xff] %vm240_vm2, %v239_v40 }
 0x1ef   :  { %246 = vsyncpa [#allocation3], 1 }
 0x1f0   :  { %247 = vsyncpa [#allocation5], 1 }

</bundles_post_ra>
